<compile_context>
chip_gen: v6e
topology: v6e:2x2x1
jax: 0.10.0
libtpu: 0.0.40
codegen_flags: <defaults>
</compile_context>

<pallas_src>
import jax
import jax.numpy as jnp
from jax.experimental import pallas as pl
from jax.experimental.pallas import tpu as pltpu


def _scale_rows_kernel(w_ref, emb_ref, out_ref):
    # w_ref: (tR, 1) f32 ; emb_ref / out_ref: (tR, D)
    # Kernel is HBM-bandwidth bound: the f32 upcast (needed for bf16 storage;
    # v5e's VPU has no bf16 anyway) rides on idle VALU slots, so it is free.
    out_ref[...] = (emb_ref[...].astype(jnp.float32) * w_ref[...]).astype(out_ref.dtype)


def _pick_row_tile(rows, d, itemsize,
                   max_emb_tile_bytes=6 << 20,
                   max_total_vmem_bytes=40 << 20):
    """Largest row tile (multiple of 8) such that
       * one embedding tile is <= ~6 MiB (per-step DMA time >> the ~0.35 us fixed
         pipeline cost on every generation, while staying well inside v7x's
         64 MiB physical VMEM), and
       * the total double-buffered VMEM — 2x emb in + 2x out tiles plus the two
         128-lane-padded (tR,1) f32 weight buffers (tR*512 B each) — stays under
         ~40 MiB, below the explicit 48 MiB vmem_limit_bytes passed to Mosaic.
    No divisibility requirement: the grid uses pl.cdiv and Pallas masks the
    boundary block, so awkward row counts never collapse to tiny tiles or to a
    single unpipelined whole-array block."""
    emb_row_bytes = d * itemsize
    per_row_vmem = 4 * emb_row_bytes + 2 * 128 * 4   # in(x2) + out(x2) + padded weights(x2)
    cap = min(max_emb_tile_bytes // emb_row_bytes,
              max_total_vmem_bytes // per_row_vmem)
    cap = max(8, (cap // 8) * 8)
    if rows <= cap:
        return rows            # block dim == full array dim is always legal
    return cap


def word_weights_forward(input_ids, attention_mask, token_embeddings, weight_table,
                         donate_token_embeddings=False):
    """weight_table: [V] float32 (the nn.Embedding(len(vocab), 1) weights, squeezed).

    Returns (weighted_token_embeddings [B,S,D], token_weights_sum [B])."""
    B, S, D = token_embeddings.shape

    # --- cheap O(B*S) prep in plain JAX (XLA gather / reduce) ---
    token_weights = (weight_table.astype(jnp.float32)[input_ids]
                     * attention_mask.astype(jnp.float32))          # [B, S]
    token_weights_sum = jnp.sum(token_weights, axis=1)              # [B]

    # --- HBM-bandwidth-bound scale in Pallas, tiled over rows ---
    rows = B * S
    emb2d = token_embeddings.reshape(rows, D)
    w2d = token_weights.reshape(rows, 1)                            # f32, lane dim 1 == full

    itemsize = jnp.dtype(token_embeddings.dtype).itemsize
    tR = _pick_row_tile(rows, D, itemsize)
    grid = (pl.cdiv(rows, tR),)                                     # boundary block masked by Pallas

    # TODO(synk): for small/odd D (<128) fold k consecutive rows per block row
    # ([rows, D] -> [rows/k, k*D]) to keep output stores lane-dense; typical
    # hidden sizes (768/1024/4096) do not need it.
    # TODO(synk): weights could instead be shipped lane-dense as (rows/128, 128)
    # with an in-kernel XLU relayout; here the 128-lane padding of the (tR,1)
    # buffer is simply budgeted into _pick_row_tile.
    out2d = pl.pallas_call(
        _scale_rows_kernel,
        out_shape=jax.ShapeDtypeStruct((rows, D), token_embeddings.dtype),
        grid_spec=pltpu.PrefetchScalarGridSpec(
            num_scalar_prefetch=0,
            grid=grid,
            in_specs=[
                pl.BlockSpec((tR, 1), lambda i: (i, 0)),   # per-row weights
                pl.BlockSpec((tR, D), lambda i: (i, 0)),   # embeddings (lane-dense D)
            ],
            out_specs=pl.BlockSpec((tR, D), lambda i: (i, 0)),
        ),
        compiler_params=pltpu.CompilerParams(
            # Rows are independent -> shard the grid across both v7x TensorCores.
            dimension_semantics=("parallel",),
            # Explicit limit: above v5e's 16 MiB default scoped VMEM, below v7x's
            # 64 MiB physical; v5e/v6e have 128 MiB physical so this is safe there.
            vmem_limit_bytes=48 << 20),
        cost_estimate=pl.CostEstimate(
            flops=rows * D,
            transcendentals=0,
            bytes_accessed=2 * rows * D * itemsize + rows * 4),
        # Scale in place when the caller donates token_embeddings (drops one
        # rows*D HBM allocation); emb2d is operand index 1, output index 0.
        input_output_aliases=({1: 0} if donate_token_embeddings else {}),
    )(w2d, emb2d)

    return out2d.reshape(B, S, D), token_weights_sum


if __name__ == "__main__":
    # Small synthetic config consistent with the module's forward:
    #   vocab size V=16, batch B=2, seq S=8, hidden D=32
    B, S, D, V = 2, 8, 32, 16
    unknown_word_weight = 1.0

    key = jax.random.PRNGKey(0)
    k_ids, k_emb = jax.random.split(key, 2)

    # Deterministic per-vocab weights (idf-like); some tokens fall back to
    # unknown_word_weight, mimicking WordWeights.__init__.
    idx = jnp.arange(V, dtype=jnp.float32)
    known = (jnp.arange(V) % 3) != 0
    weight_table = jnp.where(known, 0.5 + 0.1 * idx, unknown_word_weight).astype(jnp.float32)

    input_ids = jax.random.randint(k_ids, (B, S), 0, V, dtype=jnp.int32)
    # attention mask: first row fully on, second row has padding at the end
    attention_mask = jnp.array(
        [[1] * S,
         [1] * (S - 3) + [0] * 3], dtype=jnp.int32)
    token_embeddings = jax.random.normal(k_emb, (B, S, D), dtype=jnp.float32)

    out_emb, wsum = word_weights_forward(
        input_ids, attention_mask, token_embeddings, weight_table)
    out_emb = jax.block_until_ready(out_emb)
    wsum = jax.block_until_ready(wsum)

    # Reference check in plain JAX (mirrors the PyTorch forward exactly).
    tw_raw = weight_table[input_ids]                      # emb_layer(...).squeeze(-1)
    tw = tw_raw * attention_mask.astype(jnp.float32)
    ref_sum = jnp.sum(tw, axis=1)
    ref_emb = token_embeddings * tw[..., None]

    assert out_emb.shape == (B, S, D) and wsum.shape == (B,)
    assert jnp.allclose(out_emb, ref_emb, atol=1e-6)
    assert jnp.allclose(wsum, ref_sum, atol=1e-6)
    print("KERNEL_OK")
</pallas_src>

<mosaic_0001>
module attributes {stable_mosaic.version = 11 : i64} {
  func.func @_scale_rows_kernel(%arg0: i32, %arg1: memref<16x1xf32, #tpu.memory_space<vmem>>, %arg2: memref<16x32xf32, #tpu.memory_space<vmem>>, %arg3: memref<16x32xf32, #tpu.memory_space<vmem>>) attributes {dimension_semantics = [#tpu.dimension_semantics<parallel>], iteration_bounds = array<i64: 1>, scalar_prefetch = 0 : i64, scratch_operands = 0 : i64, tpu.core_type = #tpu.core_type<tc>, window_params = [{transform_indices = @transform_0, window_bounds = array<i64: 16, 1>}, {transform_indices = @transform_1, window_bounds = array<i64: 16, 32>}, {transform_indices = @transform_2, window_bounds = array<i64: 16, 32>}]} {
    %c0 = arith.constant 0 : index
    %c0_0 = arith.constant 0 : index
    %0 = vector.load %arg2[%c0, %c0_0] : memref<16x32xf32, #tpu.memory_space<vmem>>, vector<16x32xf32>
    %c0_1 = arith.constant 0 : index
    %c0_2 = arith.constant 0 : index
    %1 = vector.load %arg1[%c0_1, %c0_2] : memref<16x1xf32, #tpu.memory_space<vmem>>, vector<16x1xf32>
    %2 = vector.broadcast %1 : vector<16x1xf32> to vector<16x32xf32>
    %3 = arith.mulf %0, %2 : vector<16x32xf32>
    %c0_3 = arith.constant 0 : index
    %c0_4 = arith.constant 0 : index
    %4 = vector.load %arg3[%c0_3, %c0_4] : memref<16x32xf32, #tpu.memory_space<vmem>>, vector<16x32xf32>
    tpu.vector_store %arg3[%c0_3, %c0_4], %3 {strides = array<i32>} : memref<16x32xf32, #tpu.memory_space<vmem>>, vector<16x32xf32>,
    return
  }
  func.func @transform_0(%arg0: i32) -> (i32, i32) {
    %c0_i32 = arith.constant 0 : i32
    %c0_i32_0 = arith.constant 0 : i32
    return %arg0, %c0_i32 : i32, i32
  }
  func.func @transform_1(%arg0: i32) -> (i32, i32) {
    %c0_i32 = arith.constant 0 : i32
    %c0_i32_0 = arith.constant 0 : i32
    return %arg0, %c0_i32 : i32, i32
  }
  func.func @transform_2(%arg0: i32) -> (i32, i32) {
    %c0_i32 = arith.constant 0 : i32
    %c0_i32_0 = arith.constant 0 : i32
    return %arg0, %c0_i32 : i32, i32
  }
}

</mosaic_0001>

<bundles_post_ra>
// kernel: tpu_custom_call.1
= control target key start
LH: loop header
LB: loop body
LE: loop exit
PB: predicated region body
PF: predicated region fallthrough
CT: control target
= control target key end

     0   :  { %v74_v1 = vmov 0   ;;  %s108_s0 = inlined_call_operand.vmem [shape: f32[16,1], index: 0, kind: input, shape index: {}]   ;;  %s109_s1 = inlined_call_operand.vmem [shape: f32[16,32], index: 1, kind: input, shape index: {}]   ;;  %s110_s2 = inlined_call_operand.hbm [shape: f32[16,32], index: 2, kind: output, shape index: {}]  }
   0x1   :  { %v14_v0 = vld [vmem:[%s108_s0] sm:$0xff]  ;;  %51 = vset.pattern.permute.xlu0 %v74_v1 }
   0x2   :  { %7 = vsyncpa [#allocation3], 0  ;;  %18 = vperm.xlu0 %51, %v14_v0   ;;  %v15_v2 = vld [vmem:[%s108_s0 + $0x8] sm:$0xff]  ;;  %v12_v3 = vld [vmem:[%s109_s1] sm:$0xff]  ;;  %vm28_vm0 = vcmask 261120   ;;  %s75_s15 = smov [#allocation2]  }
   0x3   :  { %s36_s16 = sshll.u32 %s75_s15, 4  ;;  %v13_v6 = vld [vmem:[%s109_s1 + $0x8] sm:$0xff]  ;;  %s37_s16 = int_to_ptr.vmem [resolvable:$true] %s36_s16 }
   0x4   :  { %s52_s0 = scalar_lea.vmem %s37_s16, 256  ;;  %p57_p1 = scmp.lt.s32.totalorder %s37_s16, %s37_s16 }
   0x5   :  { %p53_p0 = scmp.ne.s32.totalorder %s37_s16, %s52_s0  ;;  %p58_p2 = scmp.lt.s32.totalorder %s52_s0, %s52_s0 }
   0x6   :  { %23 = vperm.xlu0 %51, %v15_v2  }
   0x7   :  { %p59_p3 = por %p58_p2, %p57_p1 }
   0x9   :  { %p60_p4 = pnand %p59_p3, %p53_p0 }
  0x7d   :  { %v19_v4 = vpop.permute.xlu0 %18 }
  0x7e   :  { %v26_v5 = vmul.f32 %v19_v4, %v12_v3 }
  0x80   :  { %29 = vst.msk [vmem:[#allocation2] sm:$0xff] %vm28_vm0, %v26_v5 }
  0x81   :  { %v24_v7 = vpop.permute.xlu0 %23 }
  0x82   :  { %v27_v8 = vmul.f32 %v24_v7, %v13_v6 }
  0x84   :  { %30 = vst.msk [vmem:[#allocation2 + $0x8] sm:$0xff] %vm28_vm0, %v27_v8 }
  0x85   :  { %63 = shalt.err (!%p60_p4)
}
  0x86   :  { %s76_s19 = smov 128   ;;  %s77_s20 = smov 8  }
  0x87   :  { %42 = dma.vmem_to_hbm [thread:$0]  %s37_s16, 256, %s110_s2, [#allocation3], %s76_s19, %s76_s19, %s77_s20  }
  0x88   :  { %72 = dma.done.wait [#allocation3], 256  }
  0x89   :  { %73 = vsyncadd [#allocation3], 4294967040 }
  0x8a   :  { %46 = vsyncpa [#allocation3], 1 }

</bundles_post_ra>
